<compile_context>
chip_gen: v5e
topology: v5e:2x2
jax: 0.10.0
libtpu: 0.0.40
codegen_flags: <defaults>
</compile_context>

<pallas_src>
import functools

import jax
import jax.numpy as jnp
import numpy as np
from jax.experimental import pallas as pl
from jax.experimental.pallas import tpu as pltpu

_LANES = 128
_SUBLANES = 8
_MAX_TILE_ROWS = 512  # 512 rows x 128 lanes = 64K boxes / tile (~1 MiB per input tile)


def _wiou_kernel(pred_ref, tgt_ref, loss_ref, *, weight, eps, fold_weight):
    # pred_ref / tgt_ref: (4, TM, 128) f32 VMEM tiles, component-major.
    # loss_ref:           (TM, 128)    f32 VMEM tile (lane-dense, full vregs).
    p_xmax = pred_ref[0]
    p_xmin = pred_ref[1]
    p_ymax = pred_ref[2]
    p_ymin = pred_ref[3]
    t_xmax = tgt_ref[0]
    t_xmin = tgt_ref[1]
    t_ymax = tgt_ref[2]
    t_ymin = tgt_ref[3]

    inter_w = jnp.maximum(
        jnp.minimum(p_xmax, t_xmax) - jnp.maximum(p_xmin, t_xmin), 0.0)
    inter_h = jnp.maximum(
        jnp.minimum(p_ymax, t_ymax) - jnp.maximum(p_ymin, t_ymin), 0.0)
    inter_area = inter_w * inter_h

    pred_area = (jnp.maximum(p_xmax - p_xmin, 0.0)
                 * jnp.maximum(p_ymax - p_ymin, 0.0))
    tgt_area = (jnp.maximum(t_xmax - t_xmin, 0.0)
                * jnp.maximum(t_ymax - t_ymin, 0.0))

    union = pred_area + tgt_area - inter_area + eps
    iou = inter_area / union  # exact divide: pl.reciprocal(approx) would break 1e-5 tol

    if fold_weight:
        loss_ref[...] = weight - weight * iou
    else:
        loss_ref[...] = 1.0 - iou


def _round_up(x, m):
    return (x + m - 1) // m * m


def weighted_iou_loss(pred_boxes, target_boxes, weight=1.0, eps=1e-6):
    """pred_boxes / target_boxes: [..., 4] float32 in (xmax, xmin, ymax, ymin)."""
    assert pred_boxes.shape == target_boxes.shape
    assert pred_boxes.shape[-1] == 4

    batch_shape = pred_boxes.shape[:-1]
    n_boxes = int(np.prod(batch_shape)) if batch_shape else 1

    # torch semantics: weight may be a list -> tensor; apply by broadcast in JAX.
    weight_is_array = isinstance(weight, (list, tuple, np.ndarray, jnp.ndarray))

    # --- layout glue (plain JAX; cast+transpose+pad fuse into one XLA op) ---
    # (..., 4) box-major -> (4, M, 128) component-major full-vreg slabs.
    m_rows = pl.cdiv(n_boxes, _LANES)
    tile_rows = min(_MAX_TILE_ROWS, _round_up(m_rows, _SUBLANES))
    m_pad = _round_up(m_rows, tile_rows)
    n_pad = m_pad * _LANES

    def to_slabs(boxes):
        cm = jnp.transpose(boxes.reshape(n_boxes, 4).astype(jnp.float32))  # (4, N)
        cm = jnp.pad(cm, ((0, 0), (0, n_pad - n_boxes)))
        return cm.reshape(4, m_pad, _LANES)

    pred_cm = to_slabs(pred_boxes)
    tgt_cm = to_slabs(target_boxes)

    kernel = functools.partial(
        _wiou_kernel,
        weight=1.0 if weight_is_array else float(weight),
        eps=float(eps),
        fold_weight=not weight_is_array,
    )

    n_blocks = m_pad // tile_rows
    loss_pad = pl.pallas_call(
        kernel,
        out_shape=jax.ShapeDtypeStruct((m_pad, _LANES), jnp.float32),
        grid_spec=pltpu.PrefetchScalarGridSpec(
            num_scalar_prefetch=0,
            grid=(n_blocks,),
            in_specs=[
                pl.BlockSpec((4, tile_rows, _LANES), lambda i: (0, i, 0)),
                pl.BlockSpec((4, tile_rows, _LANES), lambda i: (0, i, 0)),
            ],
            out_specs=pl.BlockSpec((tile_rows, _LANES), lambda i: (i, 0)),
        ),
        compiler_params=pltpu.CompilerParams(
            dimension_semantics=("parallel",)),
        cost_estimate=pl.CostEstimate(
            flops=15 * n_pad, transcendentals=0, bytes_accessed=9 * n_pad * 4),
    )(pred_cm, tgt_cm)

    # Drop padded lanes *before* they can touch the mean.
    loss = loss_pad.reshape(-1)[:n_boxes].reshape(batch_shape)
    if weight_is_array:
        loss = jnp.asarray(weight, dtype=jnp.float32) * loss
    return loss, jnp.mean(loss)


def _reference(pred_boxes, target_boxes, weight=1.0, eps=1e-6):
    p_xmax, p_xmin, p_ymax, p_ymin = [pred_boxes[..., i] for i in range(4)]
    t_xmax, t_xmin, t_ymax, t_ymin = [target_boxes[..., i] for i in range(4)]
    inter_xmin = jnp.maximum(p_xmin, t_xmin)
    inter_ymin = jnp.maximum(p_ymin, t_ymin)
    inter_xmax = jnp.minimum(p_xmax, t_xmax)
    inter_ymax = jnp.minimum(p_ymax, t_ymax)
    inter_area = jnp.maximum(inter_xmax - inter_xmin, 0.0) * jnp.maximum(
        inter_ymax - inter_ymin, 0.0)
    pred_area = jnp.maximum(p_xmax - p_xmin, 0.0) * jnp.maximum(p_ymax - p_ymin, 0.0)
    tgt_area = jnp.maximum(t_xmax - t_xmin, 0.0) * jnp.maximum(t_ymax - t_ymin, 0.0)
    union = pred_area + tgt_area - inter_area + eps
    loss = weight * (1.0 - inter_area / union)
    return loss, loss.mean()


if __name__ == "__main__":
    # Deterministic params (module __init__): scalar weight, eps.
    WEIGHT = 2.0
    EPS = 1e-6

    key = jax.random.PRNGKey(0)

    def make_boxes(k, b, nb):
        ka, kb = jax.random.split(k)
        mins = jax.random.uniform(ka, (b, nb, 2), minval=0.0, maxval=10.0)
        sizes = jax.random.uniform(kb, (b, nb, 2), minval=0.1, maxval=5.0)
        maxs = mins + sizes
        # stack as [xmax, xmin, ymax, ymin]
        return jnp.stack(
            [maxs[..., 0], mins[..., 0], maxs[..., 1], mins[..., 1]], axis=-1
        ).astype(jnp.float32)

    k1, k2, k3, k4 = jax.random.split(key, 4)

    # Case 1: batch=2, 128 boxes per batch (exact multiple of a lane row).
    pred = make_boxes(k1, 2, 128)
    target = make_boxes(k2, 2, 128)
    loss, mean_loss = weighted_iou_loss(pred, target, weight=WEIGHT, eps=EPS)
    jax.block_until_ready((loss, mean_loss))
    ref_loss, ref_mean = _reference(pred, target, weight=WEIGHT, eps=EPS)
    np.testing.assert_allclose(np.asarray(loss), np.asarray(ref_loss),
                               rtol=1e-5, atol=1e-5)
    np.testing.assert_allclose(float(mean_loss), float(ref_mean),
                               rtol=1e-5, atol=1e-5)
    assert loss.shape == (2, 128)

    # Case 2: ragged box count (3 x 77) exercises the pad-and-slice path.
    pred2 = make_boxes(k3, 3, 77)
    target2 = make_boxes(k4, 3, 77)
    loss2, mean2 = weighted_iou_loss(pred2, target2, weight=WEIGHT, eps=EPS)
    jax.block_until_ready((loss2, mean2))
    ref_loss2, ref_mean2 = _reference(pred2, target2, weight=WEIGHT, eps=EPS)
    np.testing.assert_allclose(np.asarray(loss2), np.asarray(ref_loss2),
                               rtol=1e-5, atol=1e-5)
    np.testing.assert_allclose(float(mean2), float(ref_mean2),
                               rtol=1e-5, atol=1e-5)
    assert loss2.shape == (3, 77)

    print("KERNEL_OK")
</pallas_src>

<mosaic_0001>
module attributes {stable_mosaic.version = 11 : i64} {
  func.func @_wiou_kernel(%arg0: i32, %arg1: memref<4x8x128xf32, #tpu.memory_space<vmem>>, %arg2: memref<4x8x128xf32, #tpu.memory_space<vmem>>, %arg3: memref<8x128xf32, #tpu.memory_space<vmem>>) attributes {dimension_semantics = [#tpu.dimension_semantics<parallel>], iteration_bounds = array<i64: 1>, scalar_prefetch = 0 : i64, scratch_operands = 0 : i64, tpu.core_type = #tpu.core_type<tc>, window_params = [{transform_indices = @transform_0, window_bounds = array<i64: 4, 8, 128>}, {transform_indices = @transform_1, window_bounds = array<i64: 4, 8, 128>}, {transform_indices = @transform_2, window_bounds = array<i64: 8, 128>}]} {
    %c0 = arith.constant 0 : index
    %c0_0 = arith.constant 0 : index
    %c0_1 = arith.constant 0 : index
    %0 = vector.load %arg1[%c0, %c0_0, %c0_1] : memref<4x8x128xf32, #tpu.memory_space<vmem>>, vector<1x8x128xf32>
    %1 = vector.shape_cast %0 : vector<1x8x128xf32> to vector<8x128xf32>
    %c1 = arith.constant 1 : index
    %c0_2 = arith.constant 0 : index
    %c0_3 = arith.constant 0 : index
    %2 = vector.load %arg1[%c1, %c0_2, %c0_3] : memref<4x8x128xf32, #tpu.memory_space<vmem>>, vector<1x8x128xf32>
    %3 = vector.shape_cast %2 : vector<1x8x128xf32> to vector<8x128xf32>
    %c2 = arith.constant 2 : index
    %c0_4 = arith.constant 0 : index
    %c0_5 = arith.constant 0 : index
    %4 = vector.load %arg1[%c2, %c0_4, %c0_5] : memref<4x8x128xf32, #tpu.memory_space<vmem>>, vector<1x8x128xf32>
    %5 = vector.shape_cast %4 : vector<1x8x128xf32> to vector<8x128xf32>
    %c3 = arith.constant 3 : index
    %c0_6 = arith.constant 0 : index
    %c0_7 = arith.constant 0 : index
    %6 = vector.load %arg1[%c3, %c0_6, %c0_7] : memref<4x8x128xf32, #tpu.memory_space<vmem>>, vector<1x8x128xf32>
    %7 = vector.shape_cast %6 : vector<1x8x128xf32> to vector<8x128xf32>
    %c0_8 = arith.constant 0 : index
    %c0_9 = arith.constant 0 : index
    %c0_10 = arith.constant 0 : index
    %8 = vector.load %arg2[%c0_8, %c0_9, %c0_10] : memref<4x8x128xf32, #tpu.memory_space<vmem>>, vector<1x8x128xf32>
    %9 = vector.shape_cast %8 : vector<1x8x128xf32> to vector<8x128xf32>
    %c1_11 = arith.constant 1 : index
    %c0_12 = arith.constant 0 : index
    %c0_13 = arith.constant 0 : index
    %10 = vector.load %arg2[%c1_11, %c0_12, %c0_13] : memref<4x8x128xf32, #tpu.memory_space<vmem>>, vector<1x8x128xf32>
    %11 = vector.shape_cast %10 : vector<1x8x128xf32> to vector<8x128xf32>
    %c2_14 = arith.constant 2 : index
    %c0_15 = arith.constant 0 : index
    %c0_16 = arith.constant 0 : index
    %12 = vector.load %arg2[%c2_14, %c0_15, %c0_16] : memref<4x8x128xf32, #tpu.memory_space<vmem>>, vector<1x8x128xf32>
    %13 = vector.shape_cast %12 : vector<1x8x128xf32> to vector<8x128xf32>
    %c3_17 = arith.constant 3 : index
    %c0_18 = arith.constant 0 : index
    %c0_19 = arith.constant 0 : index
    %14 = vector.load %arg2[%c3_17, %c0_18, %c0_19] : memref<4x8x128xf32, #tpu.memory_space<vmem>>, vector<1x8x128xf32>
    %15 = vector.shape_cast %14 : vector<1x8x128xf32> to vector<8x128xf32>
    %16 = arith.minimumf %1, %9 : vector<8x128xf32>
    %17 = arith.maximumf %3, %11 : vector<8x128xf32>
    %18 = arith.subf %16, %17 : vector<8x128xf32>
    %cst = arith.constant 0.000000e+00 : f32
    %19 = vector.broadcast %cst : f32 to vector<8x128xf32>
    %20 = arith.maximumf %18, %19 : vector<8x128xf32>
    %21 = arith.minimumf %5, %13 : vector<8x128xf32>
    %22 = arith.maximumf %7, %15 : vector<8x128xf32>
    %23 = arith.subf %21, %22 : vector<8x128xf32>
    %cst_20 = arith.constant 0.000000e+00 : f32
    %24 = vector.broadcast %cst_20 : f32 to vector<8x128xf32>
    %25 = arith.maximumf %23, %24 : vector<8x128xf32>
    %26 = arith.mulf %20, %25 : vector<8x128xf32>
    %27 = arith.subf %1, %3 : vector<8x128xf32>
    %cst_21 = arith.constant 0.000000e+00 : f32
    %28 = vector.broadcast %cst_21 : f32 to vector<8x128xf32>
    %29 = arith.maximumf %27, %28 : vector<8x128xf32>
    %30 = arith.subf %5, %7 : vector<8x128xf32>
    %cst_22 = arith.constant 0.000000e+00 : f32
    %31 = vector.broadcast %cst_22 : f32 to vector<8x128xf32>
    %32 = arith.maximumf %30, %31 : vector<8x128xf32>
    %33 = arith.mulf %29, %32 : vector<8x128xf32>
    %34 = arith.subf %9, %11 : vector<8x128xf32>
    %cst_23 = arith.constant 0.000000e+00 : f32
    %35 = vector.broadcast %cst_23 : f32 to vector<8x128xf32>
    %36 = arith.maximumf %34, %35 : vector<8x128xf32>
    %37 = arith.subf %13, %15 : vector<8x128xf32>
    %cst_24 = arith.constant 0.000000e+00 : f32
    %38 = vector.broadcast %cst_24 : f32 to vector<8x128xf32>
    %39 = arith.maximumf %37, %38 : vector<8x128xf32>
    %40 = arith.mulf %36, %39 : vector<8x128xf32>
    %41 = arith.addf %33, %40 : vector<8x128xf32>
    %42 = arith.subf %41, %26 : vector<8x128xf32>
    %cst_25 = arith.constant 9.99999997E-7 : f32
    %43 = vector.broadcast %cst_25 : f32 to vector<8x128xf32>
    %44 = arith.addf %42, %43 : vector<8x128xf32>
    %45 = arith.divf %26, %44 : vector<8x128xf32>
    %cst_26 = arith.constant 2.000000e+00 : f32
    %46 = vector.broadcast %cst_26 : f32 to vector<8x128xf32>
    %47 = arith.mulf %46, %45 : vector<8x128xf32>
    %cst_27 = arith.constant 2.000000e+00 : f32
    %48 = vector.broadcast %cst_27 : f32 to vector<8x128xf32>
    %49 = arith.subf %48, %47 : vector<8x128xf32>
    %c0_28 = arith.constant 0 : index
    %c0_29 = arith.constant 0 : index
    %50 = vector.load %arg3[%c0_28, %c0_29] : memref<8x128xf32, #tpu.memory_space<vmem>>, vector<8x128xf32>
    tpu.vector_store %arg3[%c0_28, %c0_29], %49 {strides = array<i32>} : memref<8x128xf32, #tpu.memory_space<vmem>>, vector<8x128xf32>,
    return
  }
  func.func @transform_0(%arg0: i32) -> (i32, i32, i32) {
    %c0_i32 = arith.constant 0 : i32
    %c0_i32_0 = arith.constant 0 : i32
    %c0_i32_1 = arith.constant 0 : i32
    return %c0_i32, %arg0, %c0_i32_0 : i32, i32, i32
  }
  func.func @transform_1(%arg0: i32) -> (i32, i32, i32) {
    %c0_i32 = arith.constant 0 : i32
    %c0_i32_0 = arith.constant 0 : i32
    %c0_i32_1 = arith.constant 0 : i32
    return %c0_i32, %arg0, %c0_i32_0 : i32, i32, i32
  }
  func.func @transform_2(%arg0: i32) -> (i32, i32) {
    %c0_i32 = arith.constant 0 : i32
    %c0_i32_0 = arith.constant 0 : i32
    return %arg0, %c0_i32 : i32, i32
  }
}

</mosaic_0001>

<bundles_post_ra>
// kernel: tpu_custom_call.1
= control target key start
LH: loop header
LB: loop body
LE: loop exit
PB: predicated region body
PF: predicated region fallthrough
CT: control target
= control target key end

     0   :  { %7 = vsyncpa [#allocation3], 0  ;;  %s230_s0 = inlined_call_operand.hbm [shape: f32[4,8,128], index: 0, kind: input, shape index: {}]   ;;  %s231_s1 = inlined_call_operand.hbm [shape: f32[4,8,128], index: 1, kind: input, shape index: {}]   ;;  %s232_s2 = inlined_call_operand.hbm [shape: f32[8,128], index: 2, kind: output, shape index: {}]  }
   0x1   :  { %8 = vsyncpa [#allocation6], 0 }
   0x2   :  { %9 = vsyncpa [#allocation4], 0  ;;  %s14_s11 = sshll.u32 %s230_s0, 4  ;;  %s201_s12 = smov [#allocation2]   ;;  %s15_s11 = int_to_ptr.hbm [resolvable:$true] %s14_s11 }
   0x3   :  { %s16_s13 = sshll.u32 %s201_s12, 4  ;;  %s27_s16 = sshll.u32 %s231_s1, 4  ;;  %s17_s13 = int_to_ptr.vmem [resolvable:$true] %s16_s13  ;;  %s28_s16 = int_to_ptr.hbm [resolvable:$true] %s27_s16 }
   0x4   :  { %s202_s17 = smov 128   ;;  %s203_s18 = smov 8  }
   0x5   :  { %22 = dma.hbm_to_vmem [thread:$0]  %s15_s11, 512, %s17_s13, [#allocation3], %s202_s17, %s202_s17, %s203_s18  }
   0x6   :  { %s204_s19 = smov [#allocation5]  }
   0x7   :  { %s29_s20 = sshll.u32 %s204_s19, 4  ;;  %s30_s20 = int_to_ptr.vmem [resolvable:$true] %s29_s20 }
   0x8   :  { %35 = dma.hbm_to_vmem [thread:$0]  %s28_s16, 512, %s30_s20, [#allocation6], %s202_s17, %s202_s17, %s203_s18  }
   0x9   :  { %195 = dma.done.wait [#allocation3], 512  }
   0xa   :  { %196 = vsyncadd [#allocation3], 4294966784 }
   0xb   :  { %197 = dma.done.wait [#allocation6], 512  }
   0xc   :  { %198 = vsyncadd [#allocation6], 4294966784  ;;  %v44_v0 = vld [vmem:[#allocation2] sm:$0xff]  ;;  %v46_v1 = vld [vmem:[#allocation2 + $0x8] sm:$0xff]  ;;  %s205_s0 = smov [#allocation7]   ;;  %s105_s23 = sshll.u32 %s232_s2, 4  ;;  %s106_s23 = int_to_ptr.hbm [resolvable:$true] %s105_s23 }
   0xd   :  { %v48_v2 = vld [vmem:[#allocation2 + $0x10] sm:$0xff]  ;;  %v50_v3 = vld [vmem:[#allocation2 + $0x18] sm:$0xff]  ;;  %v51_v4 = vld [vmem:[#allocation5] sm:$0xff]  ;;  %v67_v6 = vsub.f32 %v44_v0, %v46_v1  ;;  %s103_s1 = sshll.u32 %s205_s0, 4  ;;  %s104_s1 = int_to_ptr.vmem [resolvable:$true] %s103_s1 }
   0xe   :  { %v53_v5 = vld [vmem:[#allocation5 + $0x8] sm:$0xff]  ;;  %v55_v7 = vld [vmem:[#allocation5 + $0x10] sm:$0xff]  ;;  %v57_v8 = vld [vmem:[#allocation5 + $0x18] sm:$0xff]  ;;  %v58_v9 = vmin.f32 %v44_v0, %v51_v4  ;;  %v69_v11 = vsub.f32 %v48_v2, %v50_v3 }
   0xf   :  { %v59_v10 = vmax.f32 %v46_v1, %v53_v5  ;;  %v72_v12 = vsub.f32 %v51_v4, %v53_v5  ;;  %v62_v13 = vmin.f32 %v48_v2, %v55_v7  ;;  %v63_v14 = vmax.f32 %v50_v3, %v57_v8 }
  0x10   :  { %v68_v15 = vmax.f32 %v67_v6, 0.0  ;;  %v74_v16 = vsub.f32 %v55_v7, %v57_v8  ;;  %v70_v18 = vmax.f32 %v69_v11, 0.0 }
  0x11   :  { %v60_v17 = vsub.f32 %v58_v9, %v59_v10  ;;  %v73_v19 = vmax.f32 %v72_v12, 0.0  ;;  %v64_v20 = vsub.f32 %v62_v13, %v63_v14 }
  0x12   :  { %v75_v21 = vmax.f32 %v74_v16, 0.0  ;;  %v71_v23 = vmul.f32 %v70_v18, %v68_v15 }
  0x13   :  { %v61_v22 = vmax.f32 %v60_v17, 0.0  ;;  %v65_v24 = vmax.f32 %v64_v20, 0.0 }
  0x14   :  { %v76_v25 = vmul.f32 %v75_v21, %v73_v19 }
  0x15   :  { %v66_v26 = vmul.f32 %v65_v24, %v61_v22 }
  0x16   :  { %v77_v27 = vadd.f32 %v76_v25, %v71_v23 }
  0x18   :  { %v78_v28 = vsub.f32 %v77_v27, %v66_v26 }
  0x1a   :  { %v79_v29 = vadd.f32 1e-06, %v78_v28 }
  0x1c   :  { %121 = vrcp.f32 %v79_v29  ;;  %v91_v32 = vand.u32 2147483648, %v79_v29  ;;  %vm85_vm0 = vweird.f32 %v79_v29  ;;  %v89_v34 = vand.u32 2147483647, %v79_v29 }
  0x1e   :  { %v92_v36 = vor.u32 1.1754944e-38, %v91_v32  ;;  %vm90_vm3 = vcmp.eq.f32.partialorder %v89_v34, 8.507059e+37 }
  0x22   :  { %v122_v30 = vpop.eup %121 }
  0x23   :  { %v81_v31 = vmul.f32 %v122_v30, %v79_v29  ;;  %vm86_vm1 = vweird.f32 %v122_v30 }
  0x24   :  { %vm87_vm2 = vmor %vm85_vm0, %vm86_vm1 }
  0x25   :  { %v82_v33 = vsub.f32 1.0, %v81_v31 }
  0x27   :  { %v83_v35 = vmul.f32 %v122_v30, %v82_v33 }
  0x29   :  { %v84_v37 = vadd.f32 %v122_v30, %v83_v35 }
  0x2b   :  { %v88_v38 = vsel %vm87_vm2, %v122_v30, %v84_v37 }
  0x2c   :  { %v93_v39 = vsel %vm90_vm3, %v92_v36, %v88_v38 }
  0x2d   :  { %v94_v40 = vmul.f32 %v93_v39, %v66_v26 }
  0x2f   :  { %v95_v41 = vmul.f32 2.0, %v94_v40 }
  0x31   :  { %v96_v42 = vsub.f32 2.0, %v95_v41 }
  0x33   :  { %97 = vst [vmem:[#allocation7] sm:$0xff] %v96_v42 }
  0x34   :  { %108 = dma.vmem_to_hbm [thread:$0]  %s104_s1, 128, %s106_s23, [#allocation4]  }
  0x35   :  { %199 = dma.done.wait [#allocation4], 128  }
  0x36   :  { %200 = vsyncadd [#allocation4], 4294967168 }
  0x37   :  { %113 = vsyncpa [#allocation3], 1 }
  0x38   :  { %114 = vsyncpa [#allocation6], 1 }
  0x39   :  { %115 = vsyncpa [#allocation4], 1 }

</bundles_post_ra>
